<compile_context>
chip_gen: v6e
topology: v6e:2x2x1
jax: 0.10.0
libtpu: 0.0.40
codegen_flags: <defaults>
</compile_context>

<pallas_src>
import functools
import math

import jax
import jax.numpy as jnp
import numpy as np
from jax.experimental import pallas as pl
from jax.experimental.pallas import tpu as pltpu

LN_EPS = 1e-5
BN_EPS = 1e-5
LANE_PAD = 128


# ----------------------------------------------------------------------------
# Pallas kernel: TB batch elements (TB*S rows) per grid step, everything fused.
# ----------------------------------------------------------------------------
def _transformer_kernel(x_ref, w_in_ref, wslab_ref, w2_ref, pool_ref, vecs_ref,
                        out_ref, attn_ref, *, num_heads, seq_len):
    H = num_heads
    S = seq_len
    D = w_in_ref.shape[1]                 # model_dim
    Fp = w2_ref.shape[0]                  # ffn dim (128-padded)
    R = x_ref.shape[0]                    # TB * S rows in this block
    TB = R // S
    LP = LANE_PAD
    c_w1 = 2 * H * LP                     # wslab column offsets (all 128-aligned)
    c_out = c_w1 + Fp

    # bias / affine slab row indices
    I_BIN = 0
    I_K = 1                               # rows 1..H : per-head key-side score bias
    I_BATTN = 1 + H
    I_LN1G, I_LN1B = 2 + H, 3 + H
    I_FB1, I_FB2 = 4 + H, 5 + H
    I_LN2G, I_LN2B = 6 + H, 7 + H
    I_BOUT = 8 + H

    def row(i, n):                        # (1, n) slice of the bias/affine slab
        return vecs_ref[i:i + 1, 0:n]

    x = x_ref[...]                                                    # (R, D_in)

    # input_fc with input_bn (eval) folded in
    h = jnp.dot(x, w_in_ref[...], preferred_element_type=jnp.float32) + row(I_BIN, D)

    # One matmul for all heads' folded score (A_h) and value->output (Wvo_h)
    # projections.  Every head segment starts on a 128-lane boundary, so the
    # per-head slices below are tile-aligned prefix views (no lane rotates).
    gu = jnp.dot(h, wslab_ref[:, 0:c_w1], preferred_element_type=jnp.float32)

    # Per (batch-element, head) attention; head outputs accumulate per batch
    # element and are written into VMEM scratch at static sublane-aligned rows.
    for b in range(TB):
        r0 = b * S
        h_b = h[r0:r0 + S, :]                                         # (S, D)
        acc = jnp.zeros((S, D), jnp.float32)
        for hd in range(H):
            g = gu[r0:r0 + S, hd * LP:hd * LP + D] + row(I_K + hd, D)     # (S, D)
            u = gu[r0:r0 + S, (H + hd) * LP:(H + hd) * LP + D]            # (S, D)
            s = jax.lax.dot_general(g, h_b, (((1,), (1,)), ((), ())),
                                    preferred_element_type=jnp.float32)   # (S, S)
            s = s - jnp.max(s, axis=-1, keepdims=True)
            p = jnp.exp(s)
            p = p * pl.reciprocal(jnp.sum(p, axis=-1, keepdims=True), approx=True)
            acc = acc + jnp.dot(p, u, preferred_element_type=jnp.float32)
        attn_ref[r0:r0 + S, :] = acc
    attn = attn_ref[...] + row(I_BATTN, D)        # folded out_proj / value biases
    # TODO(synk): dropout (p=0.25) inside the encoder layer is an inference no-op.

    def layer_norm(z, g, b_):
        # single-pass: mean and mean-of-squares are independent reductions
        mu = jnp.mean(z, axis=-1, keepdims=True)
        ms = jnp.mean(z * z, axis=-1, keepdims=True)
        var = ms - mu * mu
        return (z - mu) * jax.lax.rsqrt(var + LN_EPS) * g + b_

    # residual + LayerNorm1 (post-norm TransformerEncoderLayer)
    h = layer_norm(h + attn, row(I_LN1G, D), row(I_LN1B, D))

    # feed-forward (ReLU), residual + LayerNorm2 (128-aligned slab segments)
    ff = (jnp.dot(h, wslab_ref[:, c_w1:c_out], preferred_element_type=jnp.float32)
          + row(I_FB1, Fp))
    ff = jnp.maximum(ff, 0.0)
    ff = jnp.dot(ff, w2_ref[...], preferred_element_type=jnp.float32) + row(I_FB2, D)
    h = layer_norm(h + ff, row(I_LN2G, D), row(I_LN2B, D))

    # per-batch-element mean over the sequence as ONE pooling matmul: (TB,R)@(R,D)
    m = jnp.dot(pool_ref[...], h, preferred_element_type=jnp.float32)

    # output_bn (eval) + output_fc folded, lane-padded matmul -> (TB, 128)
    out_ref[...] = (jnp.dot(m, wslab_ref[:, c_out:c_out + LP],
                            preferred_element_type=jnp.float32)
                    + row(I_BOUT, LP))


def _pick_batch_block(batch, seq_len):
    """Batch elements per grid step.

    Small batches run as a single grid step (splitting <~256 rows per core is pure
    per-step overhead, even on 2-TC chips).  Large batches are tiled at a few
    hundred rows per step to fill the MXU M dimension; the tile is kept a multiple
    of 8 batch elements so the (rows, lanes) blocks stay (8,128)-legal.
    """
    max_rows = 512
    if batch * seq_len <= max_rows:
        return batch
    tb_cap = max(8, max_rows // max(seq_len, 1))
    for tb in range(tb_cap - (tb_cap % 8), 7, -8):
        if batch % tb == 0:
            return tb
    return batch


def simple_transformer_forward(x, kp):
    """x: (B, S, D_in) float32.  kp: packed kernel params (see pack_kernel_params)."""
    B, S, D_in = x.shape
    D = kp["w_in"].shape[1]
    H = kp["num_heads"]
    C = kp["feature_dim"]
    OUT_PAD = LANE_PAD

    TB = _pick_batch_block(B, S)
    G = B // TB
    R = TB * S

    x2 = x.reshape(B * S, D_in)
    # block-diagonal (TB, R) pooling matrix with 1/S entries (sequence mean)
    pool = ((jnp.arange(TB)[:, None] == (jnp.arange(R)[None, :] // S))
            .astype(jnp.float32)) / float(S)

    kernel = functools.partial(_transformer_kernel, num_heads=H, seq_len=S)

    out = pl.pallas_call(
        kernel,
        grid=(G,),
        in_specs=[
            pl.BlockSpec((R, D_in), lambda i: (i, 0)),
            pl.BlockSpec(kp["w_in"].shape, lambda i: (0, 0)),
            pl.BlockSpec(kp["wslab"].shape, lambda i: (0, 0)),
            pl.BlockSpec(kp["w2"].shape, lambda i: (0, 0)),
            pl.BlockSpec(pool.shape, lambda i: (0, 0)),
            pl.BlockSpec(kp["vecs"].shape, lambda i: (0, 0)),
        ],
        out_specs=pl.BlockSpec((TB, OUT_PAD), lambda i: (i, 0)),
        out_shape=jax.ShapeDtypeStruct((G * TB, OUT_PAD), jnp.float32),
        scratch_shapes=[pltpu.VMEM((R, D), jnp.float32)],
        compiler_params=pltpu.CompilerParams(dimension_semantics=("parallel",)),
    )(x2, kp["w_in"], kp["wslab"], kp["w2"], pool, kp["vecs"])

    return out[:, :C]


# ----------------------------------------------------------------------------
# Deterministic parameter construction (PyTorch layouts) + packing into the
# kernel-friendly folded / fused / 128-lane-aligned slab layouts.
# ----------------------------------------------------------------------------
def init_params(key, input_dim, model_dim, feature_dim, num_heads, ffn_dim):
    D, F, C = model_dim, ffn_dim, feature_dim
    ks = list(jax.random.split(key, 24))
    nrm = lambda k, shp, s=0.05: jax.random.normal(k, shp, jnp.float32) * s

    p = {}
    # input_fc
    p["w_in_t"] = nrm(ks[0], (D, input_dim))
    p["b_in"] = nrm(ks[1], (D,))
    # input_bn (eval running stats + affine)
    p["bn1_gamma"] = 1.0 + nrm(ks[2], (D,))
    p["bn1_beta"] = nrm(ks[3], (D,))
    p["bn1_mean"] = nrm(ks[4], (D,))
    p["bn1_var"] = jax.random.uniform(ks[5], (D,), jnp.float32, 0.5, 1.5)
    # self-attention
    p["in_proj_w"] = nrm(ks[6], (3 * D, D))
    p["in_proj_b"] = nrm(ks[7], (3 * D,))
    p["out_proj_w"] = nrm(ks[8], (D, D))
    p["out_proj_b"] = nrm(ks[9], (D,))
    # layer norms
    p["ln1_g"] = 1.0 + nrm(ks[10], (D,))
    p["ln1_b"] = nrm(ks[11], (D,))
    p["ln2_g"] = 1.0 + nrm(ks[12], (D,))
    p["ln2_b"] = nrm(ks[13], (D,))
    # feed-forward
    p["lin1_w"] = nrm(ks[14], (F, D))
    p["lin1_b"] = nrm(ks[15], (F,))
    p["lin2_w"] = nrm(ks[16], (D, F))
    p["lin2_b"] = nrm(ks[17], (D,))
    # output_bn
    p["bn2_gamma"] = 1.0 + nrm(ks[18], (D,))
    p["bn2_beta"] = nrm(ks[19], (D,))
    p["bn2_mean"] = nrm(ks[20], (D,))
    p["bn2_var"] = jax.random.uniform(ks[21], (D,), jnp.float32, 0.5, 1.5)
    # output_fc
    p["wout_t"] = nrm(ks[22], (C, D))
    p["bout"] = nrm(ks[23], (C,))
    return p


def pack_kernel_params(p, *, num_heads, lane_pad=LANE_PAD):
    D = p["b_in"].shape[0]
    F = p["lin1_b"].shape[0]
    C = p["bout"].shape[0]
    H = num_heads
    Dh = D // H
    F_pad = ((F + lane_pad - 1) // lane_pad) * lane_pad
    assert D <= lane_pad and C <= lane_pad

    # eval-mode BatchNorm -> per-channel scale/shift
    s1 = p["bn1_gamma"] / jnp.sqrt(p["bn1_var"] + BN_EPS)
    t1 = p["bn1_beta"] - p["bn1_mean"] * s1
    s2 = p["bn2_gamma"] / jnp.sqrt(p["bn2_var"] + BN_EPS)
    t2 = p["bn2_beta"] - p["bn2_mean"] * s2

    # input_fc with input_bn folded in
    w_in = p["w_in_t"].T * s1[None, :]                     # (D_in, D)
    b_in = p["b_in"] * s1 + t1                             # (D,)

    # attention folds (1/sqrt(Dh) scale folded into the Q side)
    scale = 1.0 / math.sqrt(Dh)
    wq = p["in_proj_w"][:D].T * scale                      # (D, D)
    bq = p["in_proj_b"][:D] * scale
    wk = p["in_proj_w"][D:2 * D].T                         # (D, D)
    wv = p["in_proj_w"][2 * D:].T                          # (D, D)
    bv = p["in_proj_b"][2 * D:]
    wo = p["out_proj_w"].T                                 # (D, D)
    bo = p["out_proj_b"]

    def pad_cols(a, width):
        return jnp.zeros((a.shape[0], width), jnp.float32).at[:, :a.shape[1]].set(a)

    a_blocks, vo_blocks, k_rows = [], [], []
    for hd in range(H):
        sl = slice(hd * Dh, (hd + 1) * Dh)
        A_h = wq[:, sl] @ wk[:, sl].T                      # (D, D)
        k_h = wk[:, sl] @ bq[sl]                           # (D,)
        Wvo_h = wv[:, sl] @ wo[sl, :]                      # (D, D)
        a_blocks.append(pad_cols(A_h, lane_pad))
        vo_blocks.append(pad_cols(Wvo_h, lane_pad))
        k_rows.append(k_h)
    b_attn = bv @ wo + bo                                  # (D,)  folded v/out biases
    # Note: key bias bk and q-bias x k-bias cross terms are row-constants along the
    # softmax axis and cancel exactly, so they are dropped.

    # feed-forward weights (F padded to a 128 multiple; padded cols/rows are zero)
    w1 = pad_cols(p["lin1_w"].T, F_pad)                    # (D, F_pad)
    w2 = jnp.zeros((F_pad, D), jnp.float32).at[:F, :].set(p["lin2_w"].T)

    # output_fc with output_bn folded in, lane-padded
    wout = p["wout_t"].T * s2[:, None]                     # (D, C)
    bout = t2 @ p["wout_t"].T + p["bout"]                  # (C,)
    wout_p = pad_cols(wout, lane_pad)

    # single weight slab, every segment starting on a 128-lane boundary:
    #   [A_0 .. A_{H-1} | Wvo_0 .. Wvo_{H-1} | w1 (F_pad) | wout (128)]
    wslab = jnp.concatenate(a_blocks + vo_blocks + [w1, wout_p], axis=1)

    # single bias/affine slab, one vector per row, padded to (multiple-of-8, vw)
    vw = max(lane_pad, F_pad)

    def pad_row(v):
        return jnp.zeros((vw,), jnp.float32).at[:v.shape[0]].set(v)

    rows = ([b_in] + k_rows + [b_attn,
            p["ln1_g"], p["ln1_b"],
            p["lin1_b"], p["lin2_b"],
            p["ln2_g"], p["ln2_b"], bout])
    vecs = jnp.stack([pad_row(v) for v in rows], axis=0)
    pad_rows = (-vecs.shape[0]) % 8
    if pad_rows:
        vecs = jnp.concatenate(
            [vecs, jnp.zeros((pad_rows, vw), jnp.float32)], axis=0)

    return {"w_in": w_in, "wslab": wslab, "w2": w2, "vecs": vecs,
            "num_heads": H, "feature_dim": C}


# ----------------------------------------------------------------------------
# Pure-JAX reference of the PyTorch forward (eval mode) from the RAW params,
# so BN folding and the Wqk / Wvo attention folds are verified end-to-end.
# ----------------------------------------------------------------------------
def reference_forward(x, p, *, num_heads):
    D = p["b_in"].shape[0]
    Dh = D // num_heads
    B, S, _ = x.shape

    h = x @ p["w_in_t"].T + p["b_in"]
    s1 = p["bn1_gamma"] / jnp.sqrt(p["bn1_var"] + BN_EPS)
    t1 = p["bn1_beta"] - p["bn1_mean"] * s1
    h = h * s1 + t1

    qkv = h @ p["in_proj_w"].T + p["in_proj_b"]
    q = qkv[..., :D].reshape(B, S, num_heads, Dh)
    k = qkv[..., D:2 * D].reshape(B, S, num_heads, Dh)
    v = qkv[..., 2 * D:].reshape(B, S, num_heads, Dh)
    s = jnp.einsum("bqhd,bkhd->bhqk", q, k) / math.sqrt(Dh)
    pr = jax.nn.softmax(s, axis=-1)
    o = jnp.einsum("bhqk,bkhd->bqhd", pr, v).reshape(B, S, D)
    attn = o @ p["out_proj_w"].T + p["out_proj_b"]

    def ln(z, g, b):
        mu = z.mean(-1, keepdims=True)
        var = ((z - mu) ** 2).mean(-1, keepdims=True)
        return (z - mu) / jnp.sqrt(var + LN_EPS) * g + b

    h = ln(h + attn, p["ln1_g"], p["ln1_b"])
    ff = jax.nn.relu(h @ p["lin1_w"].T + p["lin1_b"]) @ p["lin2_w"].T + p["lin2_b"]
    h = ln(h + ff, p["ln2_g"], p["ln2_b"])

    m = h.mean(axis=1)
    s2 = p["bn2_gamma"] / jnp.sqrt(p["bn2_var"] + BN_EPS)
    t2 = p["bn2_beta"] - p["bn2_mean"] * s2
    m = m * s2 + t2
    return m @ p["wout_t"].T + p["bout"]


if __name__ == "__main__":
    # Small shapes consistent with the module: x -> (batch, seq, input_dim)
    B, S, D_IN = 2, 8, 64
    MODEL_DIM, NUM_HEADS, FEATURE_DIM, FFN_DIM = 32, 2, 2, 128

    key = jax.random.PRNGKey(0)
    kx, kparams = jax.random.split(key)
    x = jax.random.normal(kx, (B, S, D_IN), jnp.float32)
    p = init_params(kparams, D_IN, MODEL_DIM, FEATURE_DIM, NUM_HEADS, FFN_DIM)
    kp = pack_kernel_params(p, num_heads=NUM_HEADS)

    out = simple_transformer_forward(x, kp)
    out = jax.block_until_ready(out)

    ref = reference_forward(x, p, num_heads=NUM_HEADS)
    np.testing.assert_allclose(np.asarray(out), np.asarray(ref), rtol=1e-3, atol=1e-4)

    print("KERNEL_OK")
</pallas_src>

<mosaic_0001>
module attributes {stable_mosaic.version = 11 : i64} {
  func.func @_transformer_kernel(%arg0: i32, %arg1: memref<16x64xf32, #tpu.memory_space<vmem>>, %arg2: memref<64x32xf32, #tpu.memory_space<vmem>>, %arg3: memref<32x768xf32, #tpu.memory_space<vmem>>, %arg4: memref<128x32xf32, #tpu.memory_space<vmem>>, %arg5: memref<2x16xf32, #tpu.memory_space<vmem>>, %arg6: memref<16x128xf32, #tpu.memory_space<vmem>>, %arg7: memref<2x128xf32, #tpu.memory_space<vmem>>, %arg8: memref<16x32xf32, #tpu.memory_space<vmem>>) attributes {dimension_semantics = [#tpu.dimension_semantics<parallel>], iteration_bounds = array<i64: 1>, scalar_prefetch = 0 : i64, scratch_operands = 1 : i64, tpu.core_type = #tpu.core_type<tc>, window_params = [{transform_indices = @transform_0, window_bounds = array<i64: 16, 64>}, {pipeline_mode = #tpu.pipeline_mode<synchronous>, transform_indices = @transform_1, window_bounds = array<i64: 64, 32>}, {pipeline_mode = #tpu.pipeline_mode<synchronous>, transform_indices = @transform_2, window_bounds = array<i64: 32, 768>}, {pipeline_mode = #tpu.pipeline_mode<synchronous>, transform_indices = @transform_3, window_bounds = array<i64: 128, 32>}, {pipeline_mode = #tpu.pipeline_mode<synchronous>, transform_indices = @transform_4, window_bounds = array<i64: 2, 16>}, {pipeline_mode = #tpu.pipeline_mode<synchronous>, transform_indices = @transform_5, window_bounds = array<i64: 16, 128>}, {transform_indices = @transform_6, window_bounds = array<i64: 2, 128>}]} {
    %c0 = arith.constant 0 : index
    %c0_0 = arith.constant 0 : index
    %0 = vector.load %arg1[%c0, %c0_0] : memref<16x64xf32, #tpu.memory_space<vmem>>, vector<16x64xf32>
    %c0_1 = arith.constant 0 : index
    %c0_2 = arith.constant 0 : index
    %1 = vector.load %arg2[%c0_1, %c0_2] : memref<64x32xf32, #tpu.memory_space<vmem>>, vector<64x32xf32>
    %cst = arith.constant dense<0.000000e+00> : vector<16x32xf32>
    %2 = tpu.matmul %0, %1, %cst {dimension_numbers = #tpu.dot_dimension_numbers<[1], [0], [0], [1], [0, 0, 1, 1], [], []>} : vector<16x64xf32>, vector<64x32xf32>, vector<16x32xf32> -> vector<16x32xf32>
    %c0_3 = arith.constant 0 : index
    %c0_4 = arith.constant 0 : index
    %3 = vector.load %arg6[%c0_3, %c0_4] : memref<16x128xf32, #tpu.memory_space<vmem>>, vector<1x32xf32>
    %4 = vector.broadcast %3 : vector<1x32xf32> to vector<16x32xf32>
    %5 = arith.addf %2, %4 : vector<16x32xf32>
    %c0_5 = arith.constant 0 : index
    %c0_6 = arith.constant 0 : index
    %6 = vector.load %arg3[%c0_5, %c0_6] : memref<32x768xf32, #tpu.memory_space<vmem>>, vector<32x512xf32>
    %cst_7 = arith.constant dense<0.000000e+00> : vector<16x512xf32>
    %7 = tpu.matmul %5, %6, %cst_7 {dimension_numbers = #tpu.dot_dimension_numbers<[1], [0], [0], [1], [0, 0, 1, 1], [], []>} : vector<16x32xf32>, vector<32x512xf32>, vector<16x512xf32> -> vector<16x512xf32>
    %8 = vector.extract_strided_slice %5 {offsets = [0, 0], sizes = [8, 32], strides = [1, 1]} : vector<16x32xf32> to vector<8x32xf32>
    %cst_8 = arith.constant 0.000000e+00 : f32
    %9 = vector.broadcast %cst_8 : f32 to vector<8x32xf32>
    %10 = vector.extract_strided_slice %7 {offsets = [0, 0], sizes = [8, 32], strides = [1, 1]} : vector<16x512xf32> to vector<8x32xf32>
    %c1 = arith.constant 1 : index
    %c0_9 = arith.constant 0 : index
    %11 = vector.load %arg6[%c1, %c0_9] : memref<16x128xf32, #tpu.memory_space<vmem>>, vector<1x32xf32>
    %12 = vector.broadcast %11 : vector<1x32xf32> to vector<8x32xf32>
    %13 = arith.addf %10, %12 : vector<8x32xf32>
    %14 = vector.extract_strided_slice %7 {offsets = [0, 256], sizes = [8, 32], strides = [1, 1]} : vector<16x512xf32> to vector<8x32xf32>
    %cst_10 = arith.constant dense<0.000000e+00> : vector<8x8xf32>
    %15 = tpu.matmul %13, %8, %cst_10 {dimension_numbers = #tpu.dot_dimension_numbers<[1], [1], [0], [0], [0, 0, 1, 0], [], []>} : vector<8x32xf32>, vector<8x32xf32>, vector<8x8xf32> -> vector<8x8xf32>
    %cst_11 = arith.constant dense<0xFF800000> : vector<8xf32>
    %16 = vector.multi_reduction <maximumf>, %15, %cst_11 [1] : vector<8x8xf32> to vector<8xf32>
    %17 = vector.shape_cast %16 : vector<8xf32> to vector<8x1xf32>
    %18 = vector.broadcast %17 : vector<8x1xf32> to vector<8x8xf32>
    %19 = arith.subf %15, %18 : vector<8x8xf32>
    %20 = math.exp %19 : vector<8x8xf32>
    %cst_12 = arith.constant dense<0.000000e+00> : vector<8xf32>
    %21 = vector.multi_reduction <add>, %20, %cst_12 [1] : vector<8x8xf32> to vector<8xf32>
    %22 = vector.shape_cast %21 : vector<8xf32> to vector<8x1xf32>
    %23 = tpu.reciprocal %22 {approx = true} : vector<8x1xf32> -> vector<8x1xf32>
    %24 = vector.broadcast %23 : vector<8x1xf32> to vector<8x8xf32>
    %25 = arith.mulf %20, %24 : vector<8x8xf32>
    %cst_13 = arith.constant dense<0.000000e+00> : vector<8x32xf32>
    %26 = tpu.matmul %25, %14, %cst_13 {dimension_numbers = #tpu.dot_dimension_numbers<[1], [0], [0], [1], [0, 0, 1, 1], [], []>} : vector<8x8xf32>, vector<8x32xf32>, vector<8x32xf32> -> vector<8x32xf32>
    %27 = arith.addf %9, %26 : vector<8x32xf32>
    %28 = vector.extract_strided_slice %7 {offsets = [0, 128], sizes = [8, 32], strides = [1, 1]} : vector<16x512xf32> to vector<8x32xf32>
    %c2 = arith.constant 2 : index
    %c0_14 = arith.constant 0 : index
    %29 = vector.load %arg6[%c2, %c0_14] : memref<16x128xf32, #tpu.memory_space<vmem>>, vector<1x32xf32>
    %30 = vector.broadcast %29 : vector<1x32xf32> to vector<8x32xf32>
    %31 = arith.addf %28, %30 : vector<8x32xf32>
    %32 = vector.extract_strided_slice %7 {offsets = [0, 384], sizes = [8, 32], strides = [1, 1]} : vector<16x512xf32> to vector<8x32xf32>
    %cst_15 = arith.constant dense<0.000000e+00> : vector<8x8xf32>
    %33 = tpu.matmul %31, %8, %cst_15 {dimension_numbers = #tpu.dot_dimension_numbers<[1], [1], [0], [0], [0, 0, 1, 0], [], []>} : vector<8x32xf32>, vector<8x32xf32>, vector<8x8xf32> -> vector<8x8xf32>
    %cst_16 = arith.constant dense<0xFF800000> : vector<8xf32>
    %34 = vector.multi_reduction <maximumf>, %33, %cst_16 [1] : vector<8x8xf32> to vector<8xf32>
    %35 = vector.shape_cast %34 : vector<8xf32> to vector<8x1xf32>
    %36 = vector.broadcast %35 : vector<8x1xf32> to vector<8x8xf32>
    %37 = arith.subf %33, %36 : vector<8x8xf32>
    %38 = math.exp %37 : vector<8x8xf32>
    %cst_17 = arith.constant dense<0.000000e+00> : vector<8xf32>
    %39 = vector.multi_reduction <add>, %38, %cst_17 [1] : vector<8x8xf32> to vector<8xf32>
    %40 = vector.shape_cast %39 : vector<8xf32> to vector<8x1xf32>
    %41 = tpu.reciprocal %40 {approx = true} : vector<8x1xf32> -> vector<8x1xf32>
    %42 = vector.broadcast %41 : vector<8x1xf32> to vector<8x8xf32>
    %43 = arith.mulf %38, %42 : vector<8x8xf32>
    %cst_18 = arith.constant dense<0.000000e+00> : vector<8x32xf32>
    %44 = tpu.matmul %43, %32, %cst_18 {dimension_numbers = #tpu.dot_dimension_numbers<[1], [0], [0], [1], [0, 0, 1, 1], [], []>} : vector<8x8xf32>, vector<8x32xf32>, vector<8x32xf32> -> vector<8x32xf32>
    %45 = arith.addf %27, %44 : vector<8x32xf32>
    %c0_19 = arith.constant 0 : index
    %c0_20 = arith.constant 0 : index
    %46 = vector.load %arg8[%c0_19, %c0_20] : memref<16x32xf32, #tpu.memory_space<vmem>>, vector<8x32xf32>
    tpu.vector_store %arg8[%c0_19, %c0_20], %45 {strides = array<i32>} : memref<16x32xf32, #tpu.memory_space<vmem>>, vector<8x32xf32>,
    %47 = vector.extract_strided_slice %5 {offsets = [8, 0], sizes = [8, 32], strides = [1, 1]} : vector<16x32xf32> to vector<8x32xf32>
    %cst_21 = arith.constant 0.000000e+00 : f32
    %48 = vector.broadcast %cst_21 : f32 to vector<8x32xf32>
    %49 = vector.extract_strided_slice %7 {offsets = [8, 0], sizes = [8, 32], strides = [1, 1]} : vector<16x512xf32> to vector<8x32xf32>
    %c1_22 = arith.constant 1 : index
    %c0_23 = arith.constant 0 : index
    %50 = vector.load %arg6[%c1_22, %c0_23] : memref<16x128xf32, #tpu.memory_space<vmem>>, vector<1x32xf32>
    %51 = vector.broadcast %50 : vector<1x32xf32> to vector<8x32xf32>
    %52 = arith.addf %49, %51 : vector<8x32xf32>
    %53 = vector.extract_strided_slice %7 {offsets = [8, 256], sizes = [8, 32], strides = [1, 1]} : vector<16x512xf32> to vector<8x32xf32>
    %cst_24 = arith.constant dense<0.000000e+00> : vector<8x8xf32>
    %54 = tpu.matmul %52, %47, %cst_24 {dimension_numbers = #tpu.dot_dimension_numbers<[1], [1], [0], [0], [0, 0, 1, 0], [], []>} : vector<8x32xf32>, vector<8x32xf32>, vector<8x8xf32> -> vector<8x8xf32>
    %cst_25 = arith.constant dense<0xFF800000> : vector<8xf32>
    %55 = vector.multi_reduction <maximumf>, %54, %cst_25 [1] : vector<8x8xf32> to vector<8xf32>
    %56 = vector.shape_cast %55 : vector<8xf32> to vector<8x1xf32>
    %57 = vector.broadcast %56 : vector<8x1xf32> to vector<8x8xf32>
    %58 = arith.subf %54, %57 : vector<8x8xf32>
    %59 = math.exp %58 : vector<8x8xf32>
    %cst_26 = arith.constant dense<0.000000e+00> : vector<8xf32>
    %60 = vector.multi_reduction <add>, %59, %cst_26 [1] : vector<8x8xf32> to vector<8xf32>
    %61 = vector.shape_cast %60 : vector<8xf32> to vector<8x1xf32>
    %62 = tpu.reciprocal %61 {approx = true} : vector<8x1xf32> -> vector<8x1xf32>
    %63 = vector.broadcast %62 : vector<8x1xf32> to vector<8x8xf32>
    %64 = arith.mulf %59, %63 : vector<8x8xf32>
    %cst_27 = arith.constant dense<0.000000e+00> : vector<8x32xf32>
    %65 = tpu.matmul %64, %53, %cst_27 {dimension_numbers = #tpu.dot_dimension_numbers<[1], [0], [0], [1], [0, 0, 1, 1], [], []>} : vector<8x8xf32>, vector<8x32xf32>, vector<8x32xf32> -> vector<8x32xf32>
    %66 = arith.addf %48, %65 : vector<8x32xf32>
    %67 = vector.extract_strided_slice %7 {offsets = [8, 128], sizes = [8, 32], strides = [1, 1]} : vector<16x512xf32> to vector<8x32xf32>
    %c2_28 = arith.constant 2 : index
    %c0_29 = arith.constant 0 : index
    %68 = vector.load %arg6[%c2_28, %c0_29] : memref<16x128xf32, #tpu.memory_space<vmem>>, vector<1x32xf32>
    %69 = vector.broadcast %68 : vector<1x32xf32> to vector<8x32xf32>
    %70 = arith.addf %67, %69 : vector<8x32xf32>
    %71 = vector.extract_strided_slice %7 {offsets = [8, 384], sizes = [8, 32], strides = [1, 1]} : vector<16x512xf32> to vector<8x32xf32>
    %cst_30 = arith.constant dense<0.000000e+00> : vector<8x8xf32>
    %72 = tpu.matmul %70, %47, %cst_30 {dimension_numbers = #tpu.dot_dimension_numbers<[1], [1], [0], [0], [0, 0, 1, 0], [], []>} : vector<8x32xf32>, vector<8x32xf32>, vector<8x8xf32> -> vector<8x8xf32>
    %cst_31 = arith.constant dense<0xFF800000> : vector<8xf32>
    %73 = vector.multi_reduction <maximumf>, %72, %cst_31 [1] : vector<8x8xf32> to vector<8xf32>
    %74 = vector.shape_cast %73 : vector<8xf32> to vector<8x1xf32>
    %75 = vector.broadcast %74 : vector<8x1xf32> to vector<8x8xf32>
    %76 = arith.subf %72, %75 : vector<8x8xf32>
    %77 = math.exp %76 : vector<8x8xf32>
    %cst_32 = arith.constant dense<0.000000e+00> : vector<8xf32>
    %78 = vector.multi_reduction <add>, %77, %cst_32 [1] : vector<8x8xf32> to vector<8xf32>
    %79 = vector.shape_cast %78 : vector<8xf32> to vector<8x1xf32>
    %80 = tpu.reciprocal %79 {approx = true} : vector<8x1xf32> -> vector<8x1xf32>
    %81 = vector.broadcast %80 : vector<8x1xf32> to vector<8x8xf32>
    %82 = arith.mulf %77, %81 : vector<8x8xf32>
    %cst_33 = arith.constant dense<0.000000e+00> : vector<8x32xf32>
    %83 = tpu.matmul %82, %71, %cst_33 {dimension_numbers = #tpu.dot_dimension_numbers<[1], [0], [0], [1], [0, 0, 1, 1], [], []>} : vector<8x8xf32>, vector<8x32xf32>, vector<8x32xf32> -> vector<8x32xf32>
    %84 = arith.addf %66, %83 : vector<8x32xf32>
    %c8 = arith.constant 8 : index
    %c0_34 = arith.constant 0 : index
    %85 = vector.load %arg8[%c8, %c0_34] : memref<16x32xf32, #tpu.memory_space<vmem>>, vector<8x32xf32>
    tpu.vector_store %arg8[%c8, %c0_34], %84 {strides = array<i32>} : memref<16x32xf32, #tpu.memory_space<vmem>>, vector<8x32xf32>,
    %c0_35 = arith.constant 0 : index
    %c0_36 = arith.constant 0 : index
    %86 = vector.load %arg8[%c0_35, %c0_36] : memref<16x32xf32, #tpu.memory_space<vmem>>, vector<16x32xf32>
    %c3 = arith.constant 3 : index
    %c0_37 = arith.constant 0 : index
    %87 = vector.load %arg6[%c3, %c0_37] : memref<16x128xf32, #tpu.memory_space<vmem>>, vector<1x32xf32>
    %88 = vector.broadcast %87 : vector<1x32xf32> to vector<16x32xf32>
    %89 = arith.addf %86, %88 : vector<16x32xf32>
    %90 = arith.addf %5, %89 : vector<16x32xf32>
    %c4 = arith.constant 4 : index
    %c0_38 = arith.constant 0 : index
    %91 = vector.load %arg6[%c4, %c0_38] : memref<16x128xf32, #tpu.memory_space<vmem>>, vector<1x32xf32>
    %c5 = arith.constant 5 : index
    %c0_39 = arith.constant 0 : index
    %92 = vector.load %arg6[%c5, %c0_39] : memref<16x128xf32, #tpu.memory_space<vmem>>, vector<1x32xf32>
    %cst_40 = arith.constant dense<0.000000e+00> : vector<16xf32>
    %93 = vector.multi_reduction <add>, %90, %cst_40 [1] : vector<16x32xf32> to vector<16xf32>
    %94 = vector.shape_cast %93 : vector<16xf32> to vector<16x1xf32>
    %cst_41 = arith.constant 3.200000e+01 : f32
    %95 = vector.broadcast %cst_41 : f32 to vector<16x1xf32>
    %96 = arith.divf %94, %95 : vector<16x1xf32>
    %97 = arith.mulf %90, %90 : vector<16x32xf32>
    %cst_42 = arith.constant dense<0.000000e+00> : vector<16xf32>
    %98 = vector.multi_reduction <add>, %97, %cst_42 [1] : vector<16x32xf32> to vector<16xf32>
    %99 = vector.shape_cast %98 : vector<16xf32> to vector<16x1xf32>
    %cst_43 = arith.constant 3.200000e+01 : f32
    %100 = vector.broadcast %cst_43 : f32 to vector<16x1xf32>
    %101 = arith.divf %99, %100 : vector<16x1xf32>
    %102 = arith.mulf %96, %96 : vector<16x1xf32>
    %103 = arith.subf %101, %102 : vector<16x1xf32>
    %104 = vector.broadcast %96 : vector<16x1xf32> to vector<16x32xf32>
    %105 = arith.subf %90, %104 : vector<16x32xf32>
    %cst_44 = arith.constant 9.99999974E-6 : f32
    %106 = vector.broadcast %cst_44 : f32 to vector<16x1xf32>
    %107 = arith.addf %103, %106 : vector<16x1xf32>
    %108 = math.rsqrt %107 : vector<16x1xf32>
    %109 = vector.broadcast %108 : vector<16x1xf32> to vector<16x32xf32>
    %110 = arith.mulf %105, %109 : vector<16x32xf32>
    %111 = vector.broadcast %91 : vector<1x32xf32> to vector<16x32xf32>
    %112 = arith.mulf %110, %111 : vector<16x32xf32>
    %113 = vector.broadcast %92 : vector<1x32xf32> to vector<16x32xf32>
    %114 = arith.addf %112, %113 : vector<16x32xf32>
    %c0_45 = arith.constant 0 : index
    %c512 = arith.constant 512 : index
    %115 = vector.load %arg3[%c0_45, %c512] : memref<32x768xf32, #tpu.memory_space<vmem>>, vector<32x128xf32>
    %cst_46 = arith.constant dense<0.000000e+00> : vector<16x128xf32>
    %116 = tpu.matmul %114, %115, %cst_46 {dimension_numbers = #tpu.dot_dimension_numbers<[1], [0], [0], [1], [0, 0, 1, 1], [], []>} : vector<16x32xf32>, vector<32x128xf32>, vector<16x128xf32> -> vector<16x128xf32>
    %c6 = arith.constant 6 : index
    %c0_47 = arith.constant 0 : index
    %117 = vector.load %arg6[%c6, %c0_47] : memref<16x128xf32, #tpu.memory_space<vmem>>, vector<1x128xf32>
    %118 = vector.broadcast %117 : vector<1x128xf32> to vector<16x128xf32>
    %119 = arith.addf %116, %118 : vector<16x128xf32>
    %cst_48 = arith.constant 0.000000e+00 : f32
    %120 = vector.broadcast %cst_48 : f32 to vector<16x128xf32>
    %121 = arith.maximumf %119, %120 : vector<16x128xf32>
    %c0_49 = arith.constant 0 : index
    %c0_50 = arith.constant 0 : index
    %122 = vector.load %arg4[%c0_49, %c0_50] : memref<128x32xf32, #tpu.memory_space<vmem>>, vector<128x32xf32>
    %cst_51 = arith.constant dense<0.000000e+00> : vector<16x32xf32>
    %123 = tpu.matmul %121, %122, %cst_51 {dimension_numbers = #tpu.dot_dimension_numbers<[1], [0], [0], [1], [0, 0, 1, 1], [], []>} : vector<16x128xf32>, vector<128x32xf32>, vector<16x32xf32> -> vector<16x32xf32>
    %c7 = arith.constant 7 : index
    %c0_52 = arith.constant 0 : index
    %124 = vector.load %arg6[%c7, %c0_52] : memref<16x128xf32, #tpu.memory_space<vmem>>, vector<1x32xf32>
    %125 = vector.broadcast %124 : vector<1x32xf32> to vector<16x32xf32>
    %126 = arith.addf %123, %125 : vector<16x32xf32>
    %127 = arith.addf %114, %126 : vector<16x32xf32>
    %c8_53 = arith.constant 8 : index
    %c0_54 = arith.constant 0 : index
    %128 = vector.load %arg6[%c8_53, %c0_54] : memref<16x128xf32, #tpu.memory_space<vmem>>, vector<1x32xf32>
    %c9 = arith.constant 9 : index
    %c0_55 = arith.constant 0 : index
    %129 = vector.load %arg6[%c9, %c0_55] : memref<16x128xf32, #tpu.memory_space<vmem>>, vector<1x32xf32>
    %cst_56 = arith.constant dense<0.000000e+00> : vector<16xf32>
    %130 = vector.multi_reduction <add>, %127, %cst_56 [1] : vector<16x32xf32> to vector<16xf32>
    %131 = vector.shape_cast %130 : vector<16xf32> to vector<16x1xf32>
    %cst_57 = arith.constant 3.200000e+01 : f32
    %132 = vector.broadcast %cst_57 : f32 to vector<16x1xf32>
    %133 = arith.divf %131, %132 : vector<16x1xf32>
    %134 = arith.mulf %127, %127 : vector<16x32xf32>
    %cst_58 = arith.constant dense<0.000000e+00> : vector<16xf32>
    %135 = vector.multi_reduction <add>, %134, %cst_58 [1] : vector<16x32xf32> to vector<16xf32>
    %136 = vector.shape_cast %135 : vector<16xf32> to vector<16x1xf32>
    %cst_59 = arith.constant 3.200000e+01 : f32
    %137 = vector.broadcast %cst_59 : f32 to vector<16x1xf32>
    %138 = arith.divf %136, %137 : vector<16x1xf32>
    %139 = arith.mulf %133, %133 : vector<16x1xf32>
    %140 = arith.subf %138, %139 : vector<16x1xf32>
    %141 = vector.broadcast %133 : vector<16x1xf32> to vector<16x32xf32>
    %142 = arith.subf %127, %141 : vector<16x32xf32>
    %cst_60 = arith.constant 9.99999974E-6 : f32
    %143 = vector.broadcast %cst_60 : f32 to vector<16x1xf32>
    %144 = arith.addf %140, %143 : vector<16x1xf32>
    %145 = math.rsqrt %144 : vector<16x1xf32>
    %146 = vector.broadcast %145 : vector<16x1xf32> to vector<16x32xf32>
    %147 = arith.mulf %142, %146 : vector<16x32xf32>
    %148 = vector.broadcast %128 : vector<1x32xf32> to vector<16x32xf32>
    %149 = arith.mulf %147, %148 : vector<16x32xf32>
    %150 = vector.broadcast %129 : vector<1x32xf32> to vector<16x32xf32>
    %151 = arith.addf %149, %150 : vector<16x32xf32>
    %c0_61 = arith.constant 0 : index
    %c0_62 = arith.constant 0 : index
    %152 = vector.load %arg5[%c0_61, %c0_62] : memref<2x16xf32, #tpu.memory_space<vmem>>, vector<2x16xf32>
    %cst_63 = arith.constant dense<0.000000e+00> : vector<2x32xf32>
    %153 = tpu.matmul %152, %151, %cst_63 {dimension_numbers = #tpu.dot_dimension_numbers<[1], [0], [0], [1], [0, 0, 1, 1], [], []>} : vector<2x16xf32>, vector<16x32xf32>, vector<2x32xf32> -> vector<2x32xf32>
    %c0_64 = arith.constant 0 : index
    %c640 = arith.constant 640 : index
    %154 = vector.load %arg3[%c0_64, %c640] : memref<32x768xf32, #tpu.memory_space<vmem>>, vector<32x128xf32>
    %cst_65 = arith.constant dense<0.000000e+00> : vector<2x128xf32>
    %155 = tpu.matmul %153, %154, %cst_65 {dimension_numbers = #tpu.dot_dimension_numbers<[1], [0], [0], [1], [0, 0, 1, 1], [], []>} : vector<2x32xf32>, vector<32x128xf32>, vector<2x128xf32> -> vector<2x128xf32>
    %c10 = arith.constant 10 : index
    %c0_66 = arith.constant 0 : index
    %156 = vector.load %arg6[%c10, %c0_66] : memref<16x128xf32, #tpu.memory_space<vmem>>, vector<1x128xf32>
    %157 = vector.broadcast %156 : vector<1x128xf32> to vector<2x128xf32>
    %158 = arith.addf %155, %157 : vector<2x128xf32>
    %c0_67 = arith.constant 0 : index
    %c0_68 = arith.constant 0 : index
    %159 = vector.load %arg7[%c0_67, %c0_68] : memref<2x128xf32, #tpu.memory_space<vmem>>, vector<2x128xf32>
    tpu.vector_store %arg7[%c0_67, %c0_68], %158 {strides = array<i32>} : memref<2x128xf32, #tpu.memory_space<vmem>>, vector<2x128xf32>,
    return
  }
  func.func @transform_0(%arg0: i32) -> (i32, i32) {
    %c0_i32 = arith.constant 0 : i32
    %c0_i32_0 = arith.constant 0 : i32
    return %arg0, %c0_i32 : i32, i32
  }
  func.func @transform_1(%arg0: i32) -> (i32, i32) {
    %c0_i32 = arith.constant 0 : i32
    %c0_i32_0 = arith.constant 0 : i32
    %c0_i32_1 = arith.constant 0 : i32
    return %c0_i32, %c0_i32_0 : i32, i32
  }
  func.func @transform_2(%arg0: i32) -> (i32, i32) {
    %c0_i32 = arith.constant 0 : i32
    %c0_i32_0 = arith.constant 0 : i32
    %c0_i32_1 = arith.constant 0 : i32
    return %c0_i32, %c0_i32_0 : i32, i32
  }
  func.func @transform_3(%arg0: i32) -> (i32, i32) {
    %c0_i32 = arith.constant 0 : i32
    %c0_i32_0 = arith.constant 0 : i32
    %c0_i32_1 = arith.constant 0 : i32
    return %c0_i32, %c0_i32_0 : i32, i32
  }
  func.func @transform_4(%arg0: i32) -> (i32, i32) {
    %c0_i32 = arith.constant 0 : i32
    %c0_i32_0 = arith.constant 0 : i32
    %c0_i32_1 = arith.constant 0 : i32
    return %c0_i32, %c0_i32_0 : i32, i32
  }
  func.func @transform_5(%arg0: i32) -> (i32, i32) {
    %c0_i32 = arith.constant 0 : i32
    %c0_i32_0 = arith.constant 0 : i32
    %c0_i32_1 = arith.constant 0 : i32
    return %c0_i32, %c0_i32_0 : i32, i32
  }
  func.func @transform_6(%arg0: i32) -> (i32, i32) {
    %c0_i32 = arith.constant 0 : i32
    %c0_i32_0 = arith.constant 0 : i32
    return %arg0, %c0_i32 : i32, i32
  }
}

</mosaic_0001>

<bundles_post_ra>
// kernel: tpu_custom_call.1
= control target key start
LH: loop header
LB: loop body
LE: loop exit
PB: predicated region body
PF: predicated region fallthrough
CT: control target
= control target key end

     0   :  { %vm39_vm0 = vcmask 523264   ;;  %s2016_s0 = inlined_call_operand.vmem [shape: f32[16,64], index: 0, kind: input, shape index: {}]   ;;  %s2017_s1 = inlined_call_operand.vmem [shape: f32[64,32], index: 1, kind: input, shape index: {}]   ;;  %s2018_s2 = inlined_call_operand.vmem [shape: f32[32,768], index: 2, kind: input, shape index: {}]   ;;  %s2019_s3 = inlined_call_operand.vmem [shape: f32[128,32], index: 3, kind: input, shape index: {}]   ;;  %s2020_s4 = inlined_call_operand.vmem [shape: f32[2,16], index: 4, kind: input, shape index: {}]   ;;  %s2021_s5 = inlined_call_operand.vmem [shape: f32[16,128], index: 5, kind: input, shape index: {}]   ;;  %s2022_s6 = inlined_call_operand.hbm [shape: f32[2,128], index: 6, kind: output, shape index: {}]  }
   0x1   :  { %v33_v0 = vld [vmem:[%s2017_s1 + $0x38] sm:$0xff]  ;;  %v32_v1 = vld [vmem:[%s2017_s1 + $0x30] sm:$0xff]  ;;  %v31_v2 = vld [vmem:[%s2017_s1 + $0x28] sm:$0xff] }
   0x2   :  { %1508 = vmatprep.subr.mxu0 %v33_v0  ;;  %v24_v3 = vld [vmem:[%s2016_s0] sm:$0xff]  ;;  %v134_v5 = vld [vmem:[%s2018_s2 + $0x98] sm:$0xff]  ;;  %v133_v6 = vld [vmem:[%s2018_s2 + $0x90] sm:$0xff] }
   0x3   :  { %1509 = vmatpush3.msra.mxu0 %v33_v0  ;;  %v30_v4 = vld [vmem:[%s2017_s1 + $0x20] sm:$0xff]  ;;  %1524 = vmatprep.mubr.msk.f32.mxu0 %vm39_vm0, %v24_v3  ;;  %v130_v7 = vld [vmem:[%s2018_s2 + $0x68] sm:$0xff] }
   0x4   :  { %1510 = vmatprep.subr.mxu0 %v32_v1  ;;  %168 = vmatprep.subr.mxu1 %v134_v5  ;;  %v129_v8 = vld [vmem:[%s2018_s2 + $0x60] sm:$0xff] }
   0x5   :  { %1511 = vmatpush3.msra.mxu0 %v32_v1 }
   0x6   :  { %11 = vsyncpa [#allocation4], 0  ;;  %1512 = vmatprep.subr.mxu0 %v31_v2  ;;  %169 = vmatpush1.msra.mxu1 %v133_v6  ;;  %v29_v9 = vld [vmem:[%s2017_s1 + $0x18] sm:$0xff]  ;;  %v28_v10 = vld [vmem:[%s2017_s1 + $0x10] sm:$0xff]  ;;  %v1680_v19 = vmov 0.0   ;;  %vm137_vm1 = vcmask 261120  }
   0x7   :  { %1513 = vmatpush3.msra.mxu0 %v31_v2  ;;  %170 = vmatprep.subr.mxu1 %v130_v7  ;;  %v27_v11 = vld [vmem:[%s2017_s1 + $0x8] sm:$0xff]  ;;  %v26_v12 = vld [vmem:[%s2017_s1] sm:$0xff]  ;;  %v126_v14 = vld [vmem:[%s2018_s2 + $0x38] sm:$0xff]  ;;  %vm1681_vm2 = vmmov 0   ;;  %vm377_vm3 = vcmask 64512   ;;  %vm1244_vm4 = vcmask 130048  }
   0x8   :  { %1514 = vmatprep.subr.mxu0 %v30_v4  ;;  %171 = vmatpush1.msra.mxu1 %v129_v8  ;;  %v25_v13 = vld [vmem:[%s2016_s0 + $0x8] sm:$0xff]  ;;  %v125_v15 = vld [vmem:[%s2018_s2 + $0x30] sm:$0xff]  ;;  %v121_v17 = vld [vmem:[%s2018_s2] sm:$0xff]  ;;  %s1682_s15 = smov [#allocation3]  }
   0x9   :  { %1515 = vmatpush3.msra.mxu0 %v30_v4  ;;  %172 = vmatprep.subr.mxu1 %v126_v14  ;;  %v122_v16 = vld [vmem:[%s2018_s2 + $0x8] sm:$0xff]  ;;  %v1415_v21 = vld [vmem:[%s2021_s5] ss:$0 sm:$0xff]  ;;  %v132_v25 = vld [vmem:[%s2018_s2 + $0x78] sm:$0xff]  ;;  %s1407_s16 = sshll.u32 %s1682_s15, 4  ;;  %s1408_s16 = int_to_ptr.vmem [resolvable:$true] %s1407_s16 }
   0xa   :  { %1516 = vmatprep.subr.mxu0 %v29_v9  ;;  %173 = vmatpush1.msra.mxu1 %v125_v15  ;;  %v136_v18 = vld [vmem:[%s2018_s2 + $0xa8] sm:$0xff]  ;;  %v135_v24 = vld [vmem:[%s2018_s2 + $0xa0] sm:$0xff]  ;;  %v131_v26 = vld [vmem:[%s2018_s2 + $0x70] sm:$0xff]  ;;  %s1658_s17 = scalar_lea.vmem %s1408_s16, 32  ;;  %p1663_p1 = scmp.lt.s32.totalorder %s1408_s16, %s1408_s16 }
   0xb   :  { %1517 = vmatpush3.msra.mxu0 %v29_v9  ;;  %174 = vmatprep.subr.mxu1 %v122_v16  ;;  %v128_v27 = vld [vmem:[%s2018_s2 + $0x48] sm:$0xff]  ;;  %v127_v29 = vld [vmem:[%s2018_s2 + $0x40] sm:$0xff]  ;;  %v124_v30 = vld [vmem:[%s2018_s2 + $0x18] sm:$0xff]  ;;  %p1659_p0 = scmp.ne.s32.totalorder %s1408_s16, %s1658_s17  ;;  %p1664_p2 = scmp.lt.s32.totalorder %s1658_s17, %s1658_s17 }
   0xc   :  { %1518 = vmatprep.subr.mxu0 %v28_v10  ;;  %175 = vmatpush1.msra.mxu1 %v121_v17  ;;  %v123_v31 = vld [vmem:[%s2018_s2 + $0x10] sm:$0xff]  ;;  %v1422_v32 = vld [vmem:[%s2021_s5 + $0x1] ss:$0 sm:$0xff]  ;;  %v1425_v36 = vld [vmem:[%s2021_s5 + $0x2] ss:$0 sm:$0xff] }
   0xd   :  { %1519 = vmatpush3.msra.mxu0 %v28_v10  ;;  %208 = vmatprep.mubr.f32.mxu1 %v1680_v19  ;;  %p1665_p3 = por %p1664_p2, %p1663_p1 }
   0xe   :  { %1520 = vmatprep.subr.mxu0 %v27_v11  ;;  %245 = vmatprep.subr.mxu1 %v136_v18 }
   0xf   :  { %1521 = vmatpush3.msra.mxu0 %v27_v11  ;;  %p1666_p4 = pnand %p1665_p3, %p1659_p0 }
  0x10   :  { %1522 = vmatprep.subr.mxu0 %v26_v12 }
  0x11   :  { %1523 = vmatpush3.msra.mxu0 %v26_v12 }
  0x12   :  { %1525 = vmatmul.mubr.msk.f32.vlgmr.msra.gmra.mxu0 %vm39_vm0, %v25_v13  ;;  %1542 = vmatprep.subr.mxu0 %v1680_v19 }
  0x13   :  { %1544 = vmatprep.mubr.msk.f32.mxu0 %vm1681_vm2, %v1680_v19 }
  0xd2   :  { %v1526_v20 = vpop.f32.mrf.mxu0 }
  0xd3   :  { %v1799_v28 = vadd.f32 %v1526_v20, %v1415_v21 }
  0xd4   :  { %v112_v22 = vpop.f32.mrf.mxu0 }
  0xd5   :  { %v1782_v23 = vadd.f32 %v1415_v21, %v112_v22 }
  0xd7   :  { %1418 = vmatmul.mubr.msk.f32.vlgmr.msra.gmra.mxu1 %vm137_vm1, %v1782_v23 }
  0xd8   :  { %246 = vmatpush1.msra.mxu1 %v135_v24  ;;  %214 = vmatprep.mubr.f32.mxu1 %v1680_v19  ;;  %v1438_v24 = vld [vmem:[%s2021_s5 + $0x3] ss:$0 sm:$0xff] }
  0xd9   :  { %247 = vmatprep.subr.mxu1 %v132_v25 }
  0xda   :  { %248 = vmatpush1.msra.mxu1 %v131_v26 }
  0xdb   :  { %249 = vmatprep.subr.mxu1 %v128_v27  ;;  %1419 = vmatmul.mubr.msk.f32.gmra.mxu1 %vm137_vm1, %v1799_v28 }
  0xdc   :  { %250 = vmatpush1.msra.mxu1 %v127_v29  ;;  %285 = vmatprep.mubr.f32.mxu1 %v1680_v19 }
  0xdd   :  { %251 = vmatprep.subr.mxu1 %v124_v30 }
  0xde   :  { %252 = vmatpush1.msra.mxu1 %v123_v31 }
  0xdf   :  { %1527 = vmatprep.subr.mxu1 %v1680_v19  ;;  %1420 = vmatmul.mubr.msk.f32.vlgmr.msra.gmra.mxu1 %vm137_vm1, %v1782_v23 }
  0xe0   :  { %1528 = vmatpush3.xpose.msk.msra.mxu1 %vm137_vm1, %v1782_v23  ;;  %291 = vmatprep.mubr.f32.mxu1 %v1680_v19 }
  0xe1   :  { %1532 = vmatprep.subr.mxu1 %v1680_v19 }
  0xe3   :  { %1421 = vmatmul.mubr.msk.f32.gmra.mxu1 %vm137_vm1, %v1799_v28 }
  0xe4   :  { %1529 = vmatprep.mubr.msk.f32.mxu1 %vm1681_vm2, %v1680_v19 }
 0x197   :  { %v210_v33 = vpop.f32.mrf.mxu1 }
 0x198   :  { %v303_v34 = vadd.f32 %v1422_v32, %v210_v33 }
 0x199   :  { %v212_v35 = vpop.f32.mrf.mxu1 }
 0x19a   :  { %1530 = vmatmul.mubr.msk.f32.vlgmr.msra.gmra.mxu1 %vm137_vm1, %v303_v34  ;;  %v394_v38 = vadd.f32 %v1425_v36, %v212_v35 }
 0x19b   :  { %1533 = vmatpush3.xpose.msk.msra.mxu1 %vm137_vm1, %v1782_v23  ;;  %v216_v37 = vpop.f32.mrf.mxu1  ;;  %1534 = vmatprep.mubr.msk.f32.mxu1 %vm1681_vm2, %v1680_v19 }
 0x19c   :  { %v631_v39 = vadd.f32 %v1422_v32, %v216_v37  ;;  %1537 = vmatprep.subr.mxu1 %v1680_v19 }
 0x19d   :  { %v218_v40 = vpop.f32.mrf.mxu1 }
 0x19e   :  { %v721_v41 = vadd.f32 %v1425_v36, %v218_v40  ;;  %1535 = vmatmul.mubr.msk.f32.vlgmr.msra.gmra.mxu1 %vm137_vm1, %v394_v38 }
 0x19f   :  { %v287_v42 = vpop.f32.mrf.mxu1  ;;  %1539 = vmatprep.mubr.msk.f32.mxu1 %vm1681_vm2, %v1680_v19 }
 0x1a0   :  { %1543 = vmatpush3.msra.mxu0 %v287_v42 }
 0x1a1   :  { %v289_v43 = vpop.f32.mrf.mxu1  ;;  %1552 = vmatprep.subr.mxu0 %v1680_v19 }
 0x1a2   :  { %1538 = vmatpush3.msra.mxu1 %v289_v43 }
 0x1a3   :  { %1547 = vmatprep.subr.mxu1 %v1680_v19  ;;  %v293_v44 = vpop.f32.mrf.mxu1 }
 0x1a5   :  { %v295_v45 = vpop.f32.mrf.mxu1 }
 0x25a   :  { %v373_v46 = vpop.f32.mrf.mxu1 }
 0x25b   :  { %v378_v47 = vsel %vm377_vm3, %v373_v46, -inf }
 0x25c   :  { %379 = vmax.xlane.f32.xlu0 %v378_v47  ;;  %v1531_v48 = vpop.f32.mrf.mxu1 }
 0x25e   :  { %v464_v49 = vpop.f32.mrf.mxu1 }
 0x25f   :  { %v468_v50 = vsel %vm377_vm3, %v464_v49, -inf }
 0x260   :  { %469 = vmax.xlane.f32.xlu0 %v468_v50  ;;  %v1536_v51 = vpop.f32.mrf.mxu1 }
 0x261   :  { %v1886_v51 = vld [vmem:[%s2021_s5 + $0x5] ss:$0 sm:$0xff] }
 0x2e5   :  { %v380_v52 = vpop.xlane.xlu0 %379 }
 0x2e6   :  { %v381_v53 = vsub.f32 %v373_v46, %v380_v52 }
 0x2e8   :  { %v382_v54 = vmul.f32 1.442695, %v381_v53 }
 0x2e9   :  { %v470_v55 = vpop.xlane.xlu0 %469 }
 0x2ea   :  { %1634 = vpow2.f32 %v382_v54  ;;  %v471_v56 = vsub.f32 %v464_v49, %v470_v55  ;;  %v1881_v49 = vld [vmem:[%s2021_s5 + $0x4] ss:$0 sm:$0xff] }
 0x2ec   :  { %v472_v57 = vmul.f32 1.442695, %v471_v56 }
 0x2ee   :  { %1636 = vpow2.f32 %v472_v57 }
 0x2f7   :  { %v1635_v58 = vpop.eup %1634 }
 0x2f8   :  { %v384_v59 = vsel %vm377_vm3, %v1635_v58, 0.0 }
 0x2f9   :  { %385 = vadd.xlane.f32.xlu1 %v384_v59 }
 0x2fb   :  { %v1637_v60 = vpop.eup %1636 }
 0x2fc   :  { %v474_v61 = vsel %vm377_vm3, %v1637_v60, 0.0 }
 0x2fd   :  { %475 = vadd.xlane.f32.xlu1 %v474_v61 }
 0x382   :  { %v386_v62 = vpop.xlane.xlu1 %385 }
 0x383   :  { %1638 = vrcp.f32 %v386_v62 }
 0x386   :  { %v476_v63 = vpop.xlane.xlu1 %475 }
 0x387   :  { %1640 = vrcp.f32 %v476_v63 }
 0x390   :  { %v1639_v0 = vpop.eup %1638 }
 0x391   :  { %v388_v1 = vmul.f32 %v1639_v0, %v1635_v58 }
 0x393   :  { %1545 = vmatmul.mubr.msk.f32.vlgmr.msra.gmra.mxu0 %vm377_vm3, %v388_v1  ;;  %v1012_v1 = vld [vmem:[%s2018_s2 + $0xb0] sm:$0xff] }
 0x394   :  { %v1641_v2 = vpop.eup %1640  ;;  %1553 = vmatpush3.xpose.msk.msra.mxu0 %vm137_vm1, %v1799_v28  ;;  %1554 = vmatprep.mubr.msk.f32.mxu0 %vm1681_vm2, %v1680_v19 }
 0x395   :  { %1562 = vmatprep.subr.mxu0 %v1680_v19  ;;  %v478_v3 = vmul.f32 %v1641_v2, %v1637_v60  ;;  %v1011_v2 = vld [vmem:[%s2018_s2 + $0x80] sm:$0xff] }
 0x397   :  { %1540 = vmatmul.mubr.msk.f32.vlgmr.msra.gmra.mxu1 %vm377_vm3, %v478_v3  ;;  %1555 = vmatmul.mubr.msk.f32.vlgmr.msra.gmra.mxu0 %vm137_vm1, %v721_v41  ;;  %v1009_v3 = vld [vmem:[%s2018_s2 + $0x20] sm:$0xff] }
 0x398   :  { %1548 = vmatpush3.xpose.msk.msra.mxu1 %vm137_vm1, %v1799_v28  ;;  %1563 = vmatpush3.msra.mxu0 %v293_v44 }
 0x399   :  { %1549 = vmatprep.mubr.msk.f32.mxu1 %vm1681_vm2, %v1680_v19  ;;  %1557 = vmatprep.subr.mxu1 %v1680_v19 }
 0x39a   :  { %1564 = vmatprep.mubr.msk.f32.mxu0 %vm1681_vm2, %v1680_v19 }
 0x39b   :  { %1550 = vmatmul.mubr.msk.f32.vlgmr.msra.gmra.mxu1 %vm137_vm1, %v631_v39 }
 0x39c   :  { %1558 = vmatpush3.msra.mxu1 %v295_v45  ;;  %1559 = vmatprep.mubr.msk.f32.mxu1 %vm1681_vm2, %v1680_v19 }
 0x39d   :  { %1567 = vmatprep.subr.mxu1 %v1012_v1 }
 0x453   :  { %v621_v4 = vpop.f32.mrf.mxu0 }
 0x455   :  { %v1546_v5 = vpop.f32.mrf.mxu0 }
 0x456   :  { %v1115_v5 = vld [vmem:[%s2019_s3 + $0x70] sm:$0xff] }
 0x457   :  { %v548_v6 = vpop.f32.mrf.mxu1  ;;  %v791_v7 = vpop.f32.mrf.mxu0 }
 0x458   :  { %v622_v8 = vadd.f32 %v621_v4, %v548_v6  ;;  %v795_v9 = vsel %vm377_vm3, %v791_v7, -inf  ;;  %v1116_v4 = vld [vmem:[%s2019_s3 + $0x78] sm:$0xff]  ;;  %v1114_v6 = vld [vmem:[%s2019_s3 + $0x68] sm:$0xff] }
 0x459   :  { %v1556_v10 = vpop.f32.mrf.mxu0  ;;  %796 = vmax.xlane.f32.xlu1 %v795_v9  ;;  %v1541_v11 = vpop.f32.mrf.mxu1  ;;  %1578 = vmatprep.subr.mxu0 %v1116_v4  ;;  %v1111_v9 = vld [vmem:[%s2019_s3 + $0x50] sm:$0xff] }
 0x45a   :  { %625 = vst.msk [vmem:[#allocation2] sm:$0xff] %vm137_vm1, %v622_v8  ;;  %v1112_v8 = vld [vmem:[%s2019_s3 + $0x58] sm:$0xff]  ;;  %v1110_v10 = vld [vmem:[%s2019_s3 + $0x48] sm:$0xff]  ;;  %v1109_v11 = vld [vmem:[%s2019_s3 + $0x40] sm:$0xff] }
 0x45b   :  { %v701_v12 = vpop.f32.mrf.mxu1 }
 0x45c   :  { %v705_v13 = vsel %vm377_vm3, %v701_v12, -inf }
 0x45d   :  { %706 = vmax.xlane.f32.xlu0 %v705_v13  ;;  %v1551_v14 = vpop.f32.mrf.mxu1  ;;  %v1107_v13 = vld [vmem:[%s2019_s3 + $0x30] sm:$0xff] }
 0x45e   :  { %v1106_v14 = vld [vmem:[%s2019_s3 + $0x28] sm:$0xff] }
 0x461   :  { %v953_v22 = vld [vmem:[#allocation2] sm:$0xff] }
 0x462   :  { %v960_v27 = vadd.f32 %v1438_v24, %v953_v22 }
 0x464   :  { %v962_v31 = vadd.f32 %v960_v27, %v1782_v23 }
 0x466   :  { %v966_v32 = vsel %vm137_vm1, %v962_v31, 0.0  ;;  %v975_v33 = vmul.f32 %v962_v31, %v962_v31 }
 0x468   :  { %v977_v34 = vsel %vm137_vm1, %v975_v33, 0.0  ;;  %v1102_v33 = vld [vmem:[%s2019_s3 + $0x8] sm:$0xff] }
 0x4e2   :  { %v797_v15 = vpop.xlane.xlu1 %796 }
 0x4e3   :  { %v798_v16 = vsub.f32 %v791_v7, %v797_v15  ;;  %v1113_v7 = vld [vmem:[%s2019_s3 + $0x60] sm:$0xff] }
 0x4e4   :  { %v1105_v15 = vld [vmem:[%s2019_s3 + $0x20] sm:$0xff] }
 0x4e5   :  { %v799_v17 = vmul.f32 1.442695, %v798_v16 }
 0x4e6   :  { %v707_v18 = vpop.xlane.xlu0 %706 }
 0x4e7   :  { %1642 = vpow2.f32 %v799_v17  ;;  %v708_v20 = vsub.f32 %v701_v12, %v707_v18  ;;  %v1108_v12 = vld [vmem:[%s2019_s3 + $0x38] sm:$0xff] }
 0x4e9   :  { %v709_v21 = vmul.f32 1.442695, %v708_v20 }
 0x4eb   :  { %1644 = vpow2.f32 %v709_v21 }
 0x4f4   :  { %v1643_v25 = vpop.eup %1642 }
 0x4f5   :  { %v801_v26 = vsel %vm377_vm3, %v1643_v25, 0.0 }
 0x4f6   :  { %802 = vadd.xlane.f32.xlu1 %v801_v26 }
 0x4f8   :  { %v1645_v29 = vpop.eup %1644 }
 0x4f9   :  { %v711_v30 = vsel %vm377_vm3, %v1645_v29, 0.0 }
 0x4fa   :  { %712 = vadd.xlane.f32.xlu0 %v711_v30 }
 0x4fe   :  { %967 = vadd.xlane.f32.xlu0 %v966_v32  ;;  %v1103_v32 = vld [vmem:[%s2019_s3 + $0x10] sm:$0xff] }
 0x502   :  { %978 = vadd.xlane.f32.xlu0 %v977_v34  ;;  %v1101_v34 = vld [vmem:[%s2019_s3] sm:$0xff] }
 0x57f   :  { %v803_v35 = vpop.xlane.xlu1 %802 }
 0x580   :  { %1646 = vrcp.f32 %v803_v35  ;;  %v1441_v35 = vld [vmem:[%s2021_s5 + $0x6] ss:$0 sm:$0xff] }
 0x583   :  { %v713_v36 = vpop.xlane.xlu0 %712 }
 0x584   :  { %1648 = vrcp.f32 %v713_v36 }
 0x587   :  { %v968_v37 = vpop.xlane.xlu0 %967 }
 0x588   :  { %v973_v38 = vmul.f32 0.03125, %v968_v37 }
 0x58a   :  { %v985_v40 = vmul.f32 %v973_v38, %v973_v38  ;;  %v989_v47 = vsub.f32 %v962_v31, %v973_v38  ;;  %v1104_v31 = vld [vmem:[%s2019_s3 + $0x18] sm:$0xff] }
 0x58b   :  { %v979_v39 = vpop.xlane.xlu0 %978 }
 0x58c   :  { %v983_v41 = vmul.f32 0.03125, %v979_v39 }
 0x58d   :  { %v1647_v42 = vpop.eup %1646 }
 0x58e   :  { %v987_v43 = vsub.f32 %v983_v41, %v985_v40  ;;  %v805_v23 = vmul.f32 %v1647_v42, %v1643_v25  ;;  %v1444_v42 = vld [vmem:[%s2021_s5 + $0x7] ss:$0 sm:$0xff] }
 0x590   :  { %v991_v44 = vadd.f32 1e-05, %v987_v43  ;;  %1560 = vmatmul.mubr.msk.f32.vlgmr.msra.gmra.mxu1 %vm377_vm3, %v805_v23 }
 0x591   :  { %v1649_v45 = vpop.eup %1648  ;;  %1568 = vmatpush3.msra.mxu1 %v1012_v1 }
 0x592   :  { %1650 = vrsqrt.f32 %v991_v44  ;;  %v715_v46 = vmul.f32 %v1649_v45, %v1645_v29  ;;  %1569 = vmatprep.subr.mxu1 %v1011_v2 }
 0x593   :  { %1570 = vmatpush3.msra.mxu1 %v1011_v2 }
 0x594   :  { %1565 = vmatmul.mubr.msk.f32.vlgmr.msra.gmra.mxu0 %vm377_vm3, %v715_v46 }
 0x595   :  { %1579 = vmatpush3.msra.mxu0 %v1116_v4 }
 0x596   :  { %1580 = vmatprep.subr.mxu0 %v1115_v5 }
 0x597   :  { %1581 = vmatpush3.msra.mxu0 %v1115_v5  ;;  %v1445_v5 = vld [vmem:[%s2021_s5 + $0x8] ss:$0 sm:$0xff] }
 0x598   :  { %1582 = vmatprep.subr.mxu0 %v1114_v6 }
 0x599   :  { %1583 = vmatpush3.msra.mxu0 %v1114_v6 }
 0x59a   :  { %1584 = vmatprep.subr.mxu0 %v1113_v7 }
 0x59b   :  { %1585 = vmatpush3.msra.mxu0 %v1113_v7 }
 0x59c   :  { %1586 = vmatprep.subr.mxu0 %v1112_v8 }
 0x59d   :  { %1587 = vmatpush3.msra.mxu0 %v1112_v8 }
 0x59e   :  { %1588 = vmatprep.subr.mxu0 %v1111_v9 }
 0x59f   :  { %v1651_v48 = vpop.eup %1650  ;;  %1589 = vmatpush3.msra.mxu0 %v1111_v9  ;;  %v1446_v9 = vld [vmem:[%s2021_s5 + $0x9] ss:$0 sm:$0xff] }
 0x5a0   :  { %v995_v50 = vmul.f32 %v1651_v48, %v989_v47  ;;  %1590 = vmatprep.subr.mxu0 %v1110_v10 }
 0x5a1   :  { %1591 = vmatpush3.msra.mxu0 %v1110_v10 }
 0x5a2   :  { %v1001_v52 = vmul.f32 %v1881_v49, %v995_v50  ;;  %1592 = vmatprep.subr.mxu0 %v1109_v11 }
 0x5a3   :  { %1593 = vmatpush3.msra.mxu0 %v1109_v11 }
 0x5a4   :  { %v1890_v53 = vadd.f32 %v1886_v51, %v1001_v52  ;;  %1594 = vmatprep.subr.mxu0 %v1108_v12 }
 0x5a5   :  { %1595 = vmatpush3.msra.mxu0 %v1108_v12 }
 0x5a6   :  { %1575 = vmatprep.mubr.msk.f32.mxu1 %vm137_vm1, %v1890_v53  ;;  %1596 = vmatprep.subr.mxu0 %v1107_v13 }
 0x5a7   :  { %1597 = vmatpush3.msra.mxu0 %v1107_v13 }
 0x5a8   :  { %1598 = vmatprep.subr.mxu0 %v1106_v14 }
 0x5a9   :  { %1599 = vmatpush3.msra.mxu0 %v1106_v14 }
 0x5aa   :  { %1600 = vmatprep.subr.mxu0 %v1105_v15 }
 0x5ab   :  { %1601 = vmatpush3.msra.mxu0 %v1105_v15  ;;  %v1243_v15 = vld [vmem:[%s2020_s4] sm:$0x3] }
 0x5ac   :  { %1602 = vmatprep.subr.mxu0 %v1104_v31 }
 0x5ad   :  { %1603 = vmatpush3.msra.mxu0 %v1104_v31 }
 0x5ae   :  { %1604 = vmatprep.subr.mxu0 %v1103_v32 }
 0x5af   :  { %1605 = vmatpush3.msra.mxu0 %v1103_v32 }
 0x5b0   :  { %1606 = vmatprep.subr.mxu0 %v1102_v33 }
 0x5b1   :  { %1607 = vmatpush3.msra.mxu0 %v1102_v33 }
 0x5b2   :  { %1608 = vmatprep.subr.mxu0 %v1101_v34 }
 0x5b3   :  { %1609 = vmatpush3.msra.mxu0 %v1101_v34 }
 0x650   :  { %v875_v54 = vpop.f32.mrf.mxu1 }
 0x652   :  { %v1561_v55 = vpop.f32.mrf.mxu1 }
 0x654   :  { %v948_v56 = vpop.f32.mrf.mxu0 }
 0x655   :  { %v949_v57 = vadd.f32 %v948_v56, %v875_v54 }
 0x656   :  { %v1566_v58 = vpop.f32.mrf.mxu0 }
 0x657   :  { %952 = vst.msk [vmem:[#allocation2 + $0x8] sm:$0xff] %vm137_vm1, %v949_v57 }
 0x65e   :  { %v954_v59 = vld [vmem:[#allocation2 + $0x8] sm:$0xff] }
 0x65f   :  { %v961_v60 = vadd.f32 %v1438_v24, %v954_v59 }
 0x661   :  { %v1896_v61 = vadd.f32 %v961_v60, %v1799_v28  ;;  %v1010_v28 = vld [vmem:[%s2018_s2 + $0x50] sm:$0xff] }
 0x662   :  { %1571 = vmatprep.subr.mxu1 %v1010_v28 }
 0x663   :  { %v969_v62 = vsel %vm137_vm1, %v1896_v61, 0.0  ;;  %v976_v63 = vmul.f32 %v1896_v61, %v1896_v61  ;;  %1572 = vmatpush3.msra.mxu1 %v1010_v28 }
 0x664   :  { %970 = vadd.xlane.f32.xlu1 %v969_v62  ;;  %1573 = vmatprep.subr.mxu1 %v1009_v3 }
 0x665   :  { %v980_v0 = vsel %vm137_vm1, %v976_v63, 0.0  ;;  %1574 = vmatpush3.msra.mxu1 %v1009_v3 }
 0x666   :  { %1613 = vmatprep.subr.mxu1 %v1680_v19 }
 0x668   :  { %981 = vadd.xlane.f32.xlu1 %v980_v0 }
 0x6ed   :  { %v971_v16 = vpop.xlane.xlu1 %970 }
 0x6ee   :  { %v974_v17 = vmul.f32 0.03125, %v971_v16  ;;  %v1321_v16 = vld [vmem:[%s2018_s2 + $0xb8] sm:$0xff] }
 0x6f0   :  { %v986_v20 = vmul.f32 %v974_v17, %v974_v17  ;;  %v990_v25 = vsub.f32 %v1896_v61, %v974_v17  ;;  %v1320_v17 = vld [vmem:[%s2018_s2 + $0x88] sm:$0xff] }
 0x6f1   :  { %v982_v18 = vpop.xlane.xlu1 %981 }
 0x6f2   :  { %v984_v21 = vmul.f32 0.03125, %v982_v18  ;;  %v1319_v18 = vld [vmem:[%s2018_s2 + $0x58] sm:$0xff] }
 0x6f4   :  { %v988_v22 = vsub.f32 %v984_v21, %v986_v20  ;;  %v1318_v20 = vld [vmem:[%s2018_s2 + $0x28] sm:$0xff] }
 0x6f6   :  { %v992_v24 = vadd.f32 1e-05, %v988_v22 }
 0x6f8   :  { %1652 = vrsqrt.f32 %v992_v24  ;;  %v1448_v24 = vld [vmem:[%s2021_s5 + $0xa] ss:$0 sm:$0xff] }
 0x705   :  { %v1653_v26 = vpop.eup %1652 }
 0x706   :  { %v996_v27 = vmul.f32 %v1653_v26, %v990_v25 }
 0x708   :  { %v1002_v29 = vmul.f32 %v1881_v49, %v996_v27 }
 0x70a   :  { %v1008_v30 = vadd.f32 %v1886_v51, %v1002_v29 }
 0x70c   :  { %1576 = vmatmul.mubr.msk.f32.vlgmr.msra.gmra.mxu1 %vm137_vm1, %v1008_v30 }
 0x70d   :  { %1617 = vmatprep.mubr.msk.f32.mxu1 %vm1681_vm2, %v1680_v19 }
 0x7cc   :  { %v1577_v36 = vpop.f32.mrf.mxu1 }
 0x7cd   :  { %v1096_v37 = vadd.f32 %v1577_v36, %v1441_v35 }
 0x7ce   :  { %v1090_v38 = vpop.f32.mrf.mxu1 }
 0x7cf   :  { %v1091_v39 = vadd.f32 %v1441_v35, %v1090_v38  ;;  %v1100_v41 = vmax.f32 %v1096_v37, 0.0 }
 0x7d1   :  { %v1099_v40 = vmax.f32 %v1091_v39, 0.0 }
 0x7d3   :  { %1610 = vmatprep.mubr.f32.mxu0 %v1099_v40 }
 0x7d4   :  { %1611 = vmatmul.mubr.f32.vlgmr.msra.gmra.mxu0 %v1100_v41 }
 0x894   :  { %v1612_v43 = vpop.f32.mrf.mxu0 }
 0x895   :  { %v1194_v23 = vadd.f32 %v1612_v43, %v1444_v42 }
 0x896   :  { %v1188_v44 = vpop.f32.mrf.mxu0 }
 0x897   :  { %v1198_v45 = vadd.f32 %v1194_v23, %v1008_v30  ;;  %v1189_v46 = vadd.f32 %v1444_v42, %v1188_v44 }
 0x899   :  { %v1197_v47 = vadd.f32 %v1189_v46, %v1890_v53  ;;  %v1204_v48 = vsel %vm137_vm1, %v1198_v45, 0.0  ;;  %v1210_v49 = vmul.f32 %v1198_v45, %v1198_v45 }
 0x89a   :  { %1205 = vadd.xlane.f32.xlu0 %v1204_v48 }
 0x89b   :  { %v1201_v50 = vsel %vm137_vm1, %v1197_v47, 0.0  ;;  %v1209_v51 = vmul.f32 %v1197_v47, %v1197_v47  ;;  %v1214_v52 = vsel %vm137_vm1, %v1210_v49, 0.0 }
 0x89c   :  { %1202 = vadd.xlane.f32.xlu1 %v1201_v50 }
 0x89d   :  { %v1211_v54 = vsel %vm137_vm1, %v1209_v51, 0.0 }
 0x89e   :  { %1215 = vadd.xlane.f32.xlu0 %v1214_v52 }
 0x8a0   :  { %1212 = vadd.xlane.f32.xlu1 %v1211_v54 }
 0x923   :  { %v1206_v55 = vpop.xlane.xlu0 %1205 }
 0x924   :  { %v1208_v56 = vmul.f32 0.03125, %v1206_v55 }
 0x925   :  { %v1203_v57 = vpop.xlane.xlu1 %1202 }
 0x926   :  { %v1207_v58 = vmul.f32 0.03125, %v1203_v57  ;;  %v1220_v53 = vmul.f32 %v1208_v56, %v1208_v56  ;;  %v1224_v3 = vsub.f32 %v1198_v45, %v1208_v56 }
 0x927   :  { %v1216_v59 = vpop.xlane.xlu0 %1215 }
 0x928   :  { %v1218_v60 = vmul.f32 0.03125, %v1216_v59  ;;  %v1219_v62 = vmul.f32 %v1207_v58, %v1207_v58  ;;  %v1223_v6 = vsub.f32 %v1197_v47, %v1207_v58 }
 0x929   :  { %v1213_v61 = vpop.xlane.xlu1 %1212 }
 0x92a   :  { %v1222_v63 = vsub.f32 %v1218_v60, %v1220_v53  ;;  %v1217_v0 = vmul.f32 0.03125, %v1213_v61 }
 0x92c   :  { %v1226_v1 = vadd.f32 1e-05, %v1222_v63  ;;  %v1221_v2 = vsub.f32 %v1217_v0, %v1219_v62 }
 0x92e   :  { %1654 = vrsqrt.f32 %v1226_v1  ;;  %v1225_v28 = vadd.f32 1e-05, %v1221_v2 }
 0x930   :  { %1656 = vrsqrt.f32 %v1225_v28 }
 0x93b   :  { %v1655_v4 = vpop.eup %1654 }
 0x93c   :  { %v1230_v7 = vmul.f32 %v1655_v4, %v1224_v3 }
 0x93d   :  { %v1657_v8 = vpop.eup %1656 }
 0x93e   :  { %v1236_v10 = vmul.f32 %v1445_v5, %v1230_v7  ;;  %v1229_v11 = vmul.f32 %v1657_v8, %v1223_v6 }
 0x940   :  { %v1242_v12 = vadd.f32 %v1446_v9, %v1236_v10  ;;  %v1235_v13 = vmul.f32 %v1445_v5, %v1229_v11 }
 0x942   :  { %1614 = vmatpush3.msra.mxu1 %v1242_v12  ;;  %v1241_v14 = vadd.f32 %v1446_v9, %v1235_v13 }
 0x943   :  { %1615 = vmatprep.subr.mxu1 %v1680_v19 }
 0x944   :  { %1616 = vmatpush3.msra.mxu1 %v1241_v14 }
 0x945   :  { %1618 = vmatmul.mubr.msk.f32.vlgmr.msra.gmra.mxu1 %vm1244_vm4, %v1243_v15  ;;  %1620 = vmatprep.subr.mxu1 %v1680_v19 }
 0x946   :  { %1621 = vmatpush3.msra.mxu1 %v1321_v16  ;;  %1628 = vmatprep.mubr.msk.f32.mxu1 %vm1681_vm2, %v1680_v19 }
 0x947   :  { %1622 = vmatprep.subr.mxu1 %v1680_v19 }
 0x948   :  { %1623 = vmatpush3.msra.mxu1 %v1320_v17 }
 0x949   :  { %1624 = vmatprep.subr.mxu1 %v1680_v19 }
 0x94a   :  { %1625 = vmatpush3.msra.mxu1 %v1319_v18 }
 0x94b   :  { %1626 = vmatprep.subr.mxu1 %v1680_v19 }
 0x94c   :  { %1627 = vmatpush3.msra.mxu1 %v1318_v20 }
 0xa05   :  { %v1314_v21 = vpop.f32.mrf.mxu1 }
 0xa06   :  { %1629 = vmatmul.mubr.msk.f32.vlgmr.msra.gmra.mxu1 %vm137_vm1, %v1314_v21 }
 0xa07   :  { %v1619_v22 = vpop.f32.mrf.mxu1 }
 0xac6   :  { %v1396_v25 = vpop.f32.mrf.mxu1 }
 0xac7   :  { %v1397_v26 = vadd.f32 %v1448_v24, %v1396_v25 }
 0xac8   :  { %v1630_v27 = vpop.f32.mrf.mxu1 }
 0xac9   :  { %1400 = vst [vmem:[#allocation3] sm:$0x3] %v1397_v26 }
 0xaca   :  { %1669 = shalt.err (!%p1666_p4)
}
 0xacb   :  { %1410 = dma.vmem_to_hbm [thread:$0]  %s1408_s16, 32, %s2022_s6, [#allocation4]  }
 0xacc   :  { %1678 = dma.done.wait [#allocation4], 32  }
 0xacd   :  { %1679 = vsyncadd [#allocation4], 4294967264 }
 0xace   :  { %1414 = vsyncpa [#allocation4], 1 }

</bundles_post_ra>
